<compile_context>
chip_gen: v7x
topology: tpu7x:2x2x1
jax: 0.10.0
libtpu: 0.0.40
codegen_flags: <defaults>
</compile_context>

<pallas_src>
import jax
import jax.numpy as jnp
from jax import lax
from jax.experimental import pallas as pl
from jax.experimental.pallas import tpu as pltpu


def _nin_kernel(p_ref, w1_ref, b1_ref, w2_ref, b2_ref, w3_ref, b3_ref, o_ref):
    # p_ref : (1, K, tp)   bf16 im2col patches, pixels on lanes
    # w1_ref: (C, K)       bf16 spatial-conv weight
    # w2/w3 : (C, C)       bf16 1x1-conv weights
    # b*    : (C, 1)       f32 biases (broadcast along lanes)
    # o_ref : (1, C, tp)   output tile (bf16 by default)
    p = p_ref[0]                                                      # (K, tp)
    h = jnp.dot(w1_ref[...], p, preferred_element_type=jnp.float32)   # (C, tp)
    h = jnp.maximum(h + b1_ref[...], 0.0)
    h = jnp.dot(w2_ref[...], h.astype(jnp.bfloat16),
                preferred_element_type=jnp.float32)
    h = jnp.maximum(h + b2_ref[...], 0.0)
    h = jnp.dot(w3_ref[...], h.astype(jnp.bfloat16),
                preferred_element_type=jnp.float32)
    h = jnp.maximum(h + b3_ref[...], 0.0)
    o_ref[0] = h.astype(o_ref.dtype)


def _im2col_cm(x, kh, kw, stride, pad):
    # x: (N, Cin, H, W) -> (N, Cin*kh*kw, Ho*Wo), channel-major (pixels last).
    # K-axis order is (cin, dy, dx), matching torch weight.reshape(Cout, -1).
    N, Cin, H, W = x.shape
    xp = jnp.pad(x, ((0, 0), (0, 0), (pad, pad), (pad, pad)))
    Ho = (H + 2 * pad - kh) // stride + 1
    Wo = (W + 2 * pad - kw) // stride + 1
    cols = []
    for dy in range(kh):
        for dx in range(kw):
            cols.append(
                xp[:, :, dy:dy + stride * Ho:stride, dx:dx + stride * Wo:stride]
            )                                           # (N, Cin, Ho, Wo)
    pat = jnp.stack(cols, axis=2)                       # (N, Cin, kh*kw, Ho, Wo)
    return pat.reshape(N, Cin * kh * kw, Ho * Wo), Ho, Wo


def _round_up(x, m):
    return (x + m - 1) // m * m


def _pick_pixel_tile(P, N, max_tp=2048):
    # Fixed lane-dense tile (multiple of 128); P gets host-padded up to a
    # multiple of tp, so there is no unbounded full-extent fallback.
    tp = min(max_tp, _round_up(P, 128))
    # v7x: make sure the "parallel" grid has >= 2 steps so both TensorCores
    # get work even at batch 1 (no-op on v5e/v6e single-TC chips).
    if N * (_round_up(P, tp) // tp) < 2 and P > 128:
        tp = _round_up(pl.cdiv(P, 2), 128)
    return tp


def nin_block(x, params, kernel_size, stride, padding,
              max_tp=2048, out_dtype=jnp.bfloat16):
    """x: (N, Cin, H, W) float32.  Returns (N, Cout, Ho, Wo) in out_dtype."""
    w1, b1, w2, b2, w3, b3 = params
    Cout = w1.shape[0]
    kh = kw = kernel_size
    N = x.shape[0]

    # bf16 im2col: the inflated patches intermediate is materialized in bf16,
    # halving the glue-phase HBM write + kernel-side read.
    patches, Ho, Wo = _im2col_cm(x.astype(jnp.bfloat16), kh, kw, stride, padding)
    _, K, P = patches.shape

    tp = _pick_pixel_tile(P, N, max_tp)
    Ppad = _round_up(P, tp)
    if Ppad != P:
        patches = jnp.pad(patches, ((0, 0), (0, 0), (0, Ppad - P)))

    # Streaming operand + all matmul weights in bf16 (single-pass MXU issue,
    # f32 accumulation); biases / epilogue stay f32.
    w1m = w1.reshape(Cout, K).astype(jnp.bfloat16)      # (Cout, K)
    w2m = w2.reshape(Cout, Cout).astype(jnp.bfloat16)   # (Cout, Cout)
    w3m = w3.reshape(Cout, Cout).astype(jnp.bfloat16)
    b1m = b1.reshape(Cout, 1)
    b2m = b2.reshape(Cout, 1)
    b3m = b3.reshape(Cout, 1)

    grid = (N, Ppad // tp)
    full = lambda shape: pl.BlockSpec(shape, lambda n, j: (0, 0))

    out_itemsize = jnp.dtype(out_dtype).itemsize
    flops = 2 * N * Ppad * (K * Cout + 2 * Cout * Cout)
    bytes_accessed = (N * K * Ppad * 2 + N * Cout * Ppad * out_itemsize
                      + Cout * K * 2 + 2 * Cout * Cout * 2 + 3 * Cout * 4)

    # VMEM budget: double-buffered streamed blocks + resident weights + slack.
    step_bytes = K * tp * 2 + Cout * tp * out_itemsize
    const_bytes = Cout * K * 2 + 2 * Cout * Cout * 2 + 3 * Cout * 4
    vmem_limit = int(min(64 << 20,
                         max(8 << 20, 4 * step_bytes + 4 * const_bytes + (2 << 20))))

    out = pl.pallas_call(
        _nin_kernel,
        out_shape=jax.ShapeDtypeStruct((N, Cout, Ppad), out_dtype),
        grid_spec=pltpu.PrefetchScalarGridSpec(
            num_scalar_prefetch=0,
            grid=grid,
            in_specs=[
                pl.BlockSpec((1, K, tp), lambda n, j: (n, 0, j)),  # patches
                full((Cout, K)),                                   # w1
                full((Cout, 1)),                                   # b1
                full((Cout, Cout)),                                # w2
                full((Cout, 1)),                                   # b2
                full((Cout, Cout)),                                # w3
                full((Cout, 1)),                                   # b3
            ],
            out_specs=pl.BlockSpec((1, Cout, tp), lambda n, j: (n, 0, j)),
        ),
        compiler_params=pltpu.CompilerParams(
            dimension_semantics=("parallel", "parallel"),
            vmem_limit_bytes=vmem_limit,
        ),
        cost_estimate=pl.CostEstimate(
            flops=flops, transcendentals=0, bytes_accessed=bytes_accessed),
    )(patches, w1m, b1m, w2m, b2m, w3m, b3m)

    # Already channel-major NCHW; drop the pixel pad, reshape is free.
    return out[:, :, :P].reshape(N, Cout, Ho, Wo)


def _reference(x, params, stride, padding, out_dtype):
    # Pure-JAX reference mirroring the kernel's numerics (bf16 matmul inputs,
    # f32 accumulation, f32 bias + ReLU, out_dtype cast at the end).
    w1, b1, w2, b2, w3, b3 = params
    dn = lax.conv_dimension_numbers(x.shape, w1.shape, ("NCHW", "OIHW", "NCHW"))
    y = lax.conv_general_dilated(
        x.astype(jnp.bfloat16), w1.astype(jnp.bfloat16), (stride, stride),
        [(padding, padding)] * 2, dimension_numbers=dn,
        preferred_element_type=jnp.float32)
    y = jnp.maximum(y + b1[None, :, None, None], 0.0)
    y = lax.conv_general_dilated(
        y.astype(jnp.bfloat16), w2.astype(jnp.bfloat16), (1, 1), [(0, 0)] * 2,
        dimension_numbers=dn, preferred_element_type=jnp.float32)
    y = jnp.maximum(y + b2[None, :, None, None], 0.0)
    y = lax.conv_general_dilated(
        y.astype(jnp.bfloat16), w3.astype(jnp.bfloat16), (1, 1), [(0, 0)] * 2,
        dimension_numbers=dn, preferred_element_type=jnp.float32)
    y = jnp.maximum(y + b3[None, :, None, None], 0.0)
    return y.astype(out_dtype)


if __name__ == "__main__":
    # Small NINBlock: in_channels=4, out_channels=32, kernel_size=3, stride=1, pad=1
    N, Cin, H, W = 2, 4, 16, 16
    Cout, ksize, stride, pad = 32, 3, 1, 1

    key = jax.random.PRNGKey(0)
    ks = jax.random.split(key, 7)
    x = jax.random.normal(ks[0], (N, Cin, H, W), jnp.float32)

    def init_conv(kw_, shape):
        fan_in = shape[1] * shape[2] * shape[3]
        bound = (1.0 / fan_in) ** 0.5
        return jax.random.uniform(kw_, shape, jnp.float32, -bound, bound)

    w1 = init_conv(ks[1], (Cout, Cin, ksize, ksize))
    b1 = jax.random.uniform(ks[2], (Cout,), jnp.float32, -0.1, 0.1)
    w2 = init_conv(ks[3], (Cout, Cout, 1, 1))
    b2 = jax.random.uniform(ks[4], (Cout,), jnp.float32, -0.1, 0.1)
    w3 = init_conv(ks[5], (Cout, Cout, 1, 1))
    b3 = jax.random.uniform(ks[6], (Cout,), jnp.float32, -0.1, 0.1)
    params = (w1, b1, w2, b2, w3, b3)

    y = jax.block_until_ready(nin_block(x, params, ksize, stride, pad))
    y_ref = jax.block_until_ready(_reference(x, params, stride, pad, y.dtype))

    assert y.shape == (N, Cout, H, W), y.shape
    err = float(jnp.max(jnp.abs(y.astype(jnp.float32) - y_ref.astype(jnp.float32))))
    assert jnp.allclose(y.astype(jnp.float32), y_ref.astype(jnp.float32),
                        atol=3e-2, rtol=3e-2), err

    print("KERNEL_OK")
</pallas_src>

<mosaic_0001>
module attributes {stable_mosaic.version = 11 : i64} {
  func.func @_nin_kernel(%arg0: i32, %arg1: i32, %arg2: memref<1x36x256xbf16, #tpu.memory_space<vmem>>, %arg3: memref<32x36xbf16, #tpu.memory_space<vmem>>, %arg4: memref<32x1xf32, #tpu.memory_space<vmem>>, %arg5: memref<32x32xbf16, #tpu.memory_space<vmem>>, %arg6: memref<32x1xf32, #tpu.memory_space<vmem>>, %arg7: memref<32x32xbf16, #tpu.memory_space<vmem>>, %arg8: memref<32x1xf32, #tpu.memory_space<vmem>>, %arg9: memref<1x32x256xbf16, #tpu.memory_space<vmem>>) attributes {dimension_semantics = [#tpu.dimension_semantics<parallel>, #tpu.dimension_semantics<parallel>], iteration_bounds = array<i64: 2, 1>, scalar_prefetch = 0 : i64, scratch_operands = 0 : i64, tpu.core_type = #tpu.core_type<tc>, window_params = [{transform_indices = @transform_0, window_bounds = array<i64: 1, 36, 256>}, {pipeline_mode = #tpu.pipeline_mode<synchronous>, transform_indices = @transform_1, window_bounds = array<i64: 32, 36>}, {pipeline_mode = #tpu.pipeline_mode<synchronous>, transform_indices = @transform_2, window_bounds = array<i64: 32, 1>}, {pipeline_mode = #tpu.pipeline_mode<synchronous>, transform_indices = @transform_3, window_bounds = array<i64: 32, 32>}, {pipeline_mode = #tpu.pipeline_mode<synchronous>, transform_indices = @transform_4, window_bounds = array<i64: 32, 1>}, {pipeline_mode = #tpu.pipeline_mode<synchronous>, transform_indices = @transform_5, window_bounds = array<i64: 32, 32>}, {pipeline_mode = #tpu.pipeline_mode<synchronous>, transform_indices = @transform_6, window_bounds = array<i64: 32, 1>}, {transform_indices = @transform_7, window_bounds = array<i64: 1, 32, 256>}]} {
    %c0 = arith.constant 0 : index
    %c0_0 = arith.constant 0 : index
    %c0_1 = arith.constant 0 : index
    %0 = vector.load %arg2[%c0, %c0_0, %c0_1] : memref<1x36x256xbf16, #tpu.memory_space<vmem>>, vector<1x36x256xbf16>
    %1 = vector.shape_cast %0 : vector<1x36x256xbf16> to vector<36x256xbf16>
    %c0_2 = arith.constant 0 : index
    %c0_3 = arith.constant 0 : index
    %2 = vector.load %arg3[%c0_2, %c0_3] : memref<32x36xbf16, #tpu.memory_space<vmem>>, vector<32x36xbf16>
    %cst = arith.constant dense<0.000000e+00> : vector<32x256xf32>
    %3 = tpu.matmul %2, %1, %cst {dimension_numbers = #tpu.dot_dimension_numbers<[1], [0], [0], [1], [0, 0, 1, 1], [], []>} : vector<32x36xbf16>, vector<36x256xbf16>, vector<32x256xf32> -> vector<32x256xf32>
    %c0_4 = arith.constant 0 : index
    %c0_5 = arith.constant 0 : index
    %4 = vector.load %arg4[%c0_4, %c0_5] : memref<32x1xf32, #tpu.memory_space<vmem>>, vector<32x1xf32>
    %5 = vector.broadcast %4 : vector<32x1xf32> to vector<32x256xf32>
    %6 = arith.addf %3, %5 : vector<32x256xf32>
    %cst_6 = arith.constant 0.000000e+00 : f32
    %7 = vector.broadcast %cst_6 : f32 to vector<32x256xf32>
    %8 = arith.maximumf %6, %7 : vector<32x256xf32>
    %c0_7 = arith.constant 0 : index
    %c0_8 = arith.constant 0 : index
    %9 = vector.load %arg5[%c0_7, %c0_8] : memref<32x32xbf16, #tpu.memory_space<vmem>>, vector<32x32xbf16>
    %10 = arith.truncf %8 : vector<32x256xf32> to vector<32x256xbf16>
    %cst_9 = arith.constant dense<0.000000e+00> : vector<32x256xf32>
    %11 = tpu.matmul %9, %10, %cst_9 {dimension_numbers = #tpu.dot_dimension_numbers<[1], [0], [0], [1], [0, 0, 1, 1], [], []>} : vector<32x32xbf16>, vector<32x256xbf16>, vector<32x256xf32> -> vector<32x256xf32>
    %c0_10 = arith.constant 0 : index
    %c0_11 = arith.constant 0 : index
    %12 = vector.load %arg6[%c0_10, %c0_11] : memref<32x1xf32, #tpu.memory_space<vmem>>, vector<32x1xf32>
    %13 = vector.broadcast %12 : vector<32x1xf32> to vector<32x256xf32>
    %14 = arith.addf %11, %13 : vector<32x256xf32>
    %cst_12 = arith.constant 0.000000e+00 : f32
    %15 = vector.broadcast %cst_12 : f32 to vector<32x256xf32>
    %16 = arith.maximumf %14, %15 : vector<32x256xf32>
    %c0_13 = arith.constant 0 : index
    %c0_14 = arith.constant 0 : index
    %17 = vector.load %arg7[%c0_13, %c0_14] : memref<32x32xbf16, #tpu.memory_space<vmem>>, vector<32x32xbf16>
    %18 = arith.truncf %16 : vector<32x256xf32> to vector<32x256xbf16>
    %cst_15 = arith.constant dense<0.000000e+00> : vector<32x256xf32>
    %19 = tpu.matmul %17, %18, %cst_15 {dimension_numbers = #tpu.dot_dimension_numbers<[1], [0], [0], [1], [0, 0, 1, 1], [], []>} : vector<32x32xbf16>, vector<32x256xbf16>, vector<32x256xf32> -> vector<32x256xf32>
    %c0_16 = arith.constant 0 : index
    %c0_17 = arith.constant 0 : index
    %20 = vector.load %arg8[%c0_16, %c0_17] : memref<32x1xf32, #tpu.memory_space<vmem>>, vector<32x1xf32>
    %21 = vector.broadcast %20 : vector<32x1xf32> to vector<32x256xf32>
    %22 = arith.addf %19, %21 : vector<32x256xf32>
    %cst_18 = arith.constant 0.000000e+00 : f32
    %23 = vector.broadcast %cst_18 : f32 to vector<32x256xf32>
    %24 = arith.maximumf %22, %23 : vector<32x256xf32>
    %25 = arith.truncf %24 : vector<32x256xf32> to vector<32x256xbf16>
    %c0_19 = arith.constant 0 : index
    %c0_20 = arith.constant 0 : index
    %c0_21 = arith.constant 0 : index
    %26 = vector.load %arg9[%c0_19, %c0_20, %c0_21] : memref<1x32x256xbf16, #tpu.memory_space<vmem>>, vector<1x32x256xbf16>
    %27 = vector.shape_cast %26 : vector<1x32x256xbf16> to vector<32x256xbf16>
    %28 = vector.shape_cast %25 : vector<32x256xbf16> to vector<1x32x256xbf16>
    tpu.vector_store %arg9[%c0_19, %c0_20, %c0_21], %28 {strides = array<i32>} : memref<1x32x256xbf16, #tpu.memory_space<vmem>>, vector<1x32x256xbf16>,
    return
  }
  func.func @transform_0(%arg0: i32, %arg1: i32) -> (i32, i32, i32) {
    %c0_i32 = arith.constant 0 : i32
    %c0_i32_0 = arith.constant 0 : i32
    return %arg0, %c0_i32, %arg1 : i32, i32, i32
  }
  func.func @transform_1(%arg0: i32, %arg1: i32) -> (i32, i32) {
    %c0_i32 = arith.constant 0 : i32
    %c0_i32_0 = arith.constant 0 : i32
    %c0_i32_1 = arith.constant 0 : i32
    return %c0_i32, %c0_i32_0 : i32, i32
  }
  func.func @transform_2(%arg0: i32, %arg1: i32) -> (i32, i32) {
    %c0_i32 = arith.constant 0 : i32
    %c0_i32_0 = arith.constant 0 : i32
    %c0_i32_1 = arith.constant 0 : i32
    return %c0_i32, %c0_i32_0 : i32, i32
  }
  func.func @transform_3(%arg0: i32, %arg1: i32) -> (i32, i32) {
    %c0_i32 = arith.constant 0 : i32
    %c0_i32_0 = arith.constant 0 : i32
    %c0_i32_1 = arith.constant 0 : i32
    return %c0_i32, %c0_i32_0 : i32, i32
  }
  func.func @transform_4(%arg0: i32, %arg1: i32) -> (i32, i32) {
    %c0_i32 = arith.constant 0 : i32
    %c0_i32_0 = arith.constant 0 : i32
    %c0_i32_1 = arith.constant 0 : i32
    return %c0_i32, %c0_i32_0 : i32, i32
  }
  func.func @transform_5(%arg0: i32, %arg1: i32) -> (i32, i32) {
    %c0_i32 = arith.constant 0 : i32
    %c0_i32_0 = arith.constant 0 : i32
    %c0_i32_1 = arith.constant 0 : i32
    return %c0_i32, %c0_i32_0 : i32, i32
  }
  func.func @transform_6(%arg0: i32, %arg1: i32) -> (i32, i32) {
    %c0_i32 = arith.constant 0 : i32
    %c0_i32_0 = arith.constant 0 : i32
    %c0_i32_1 = arith.constant 0 : i32
    return %c0_i32, %c0_i32_0 : i32, i32
  }
  func.func @transform_7(%arg0: i32, %arg1: i32) -> (i32, i32, i32) {
    %c0_i32 = arith.constant 0 : i32
    %c0_i32_0 = arith.constant 0 : i32
    return %arg0, %c0_i32, %arg1 : i32, i32, i32
  }
}

</mosaic_0001>

<bundles_post_ra>
// kernel: tpu_custom_call.1
= control target key start
LH: loop header
LB: loop body
LE: loop exit
PB: predicated region body
PF: predicated region fallthrough
CT: control target
= control target key end

     0   :  { %12 = vsyncpa [#allocation3], 0  ;;  %s1222_s0 = inlined_call_operand.vmem [shape: bf16[2,36,256], index: 0, kind: input, shape index: {}]   ;;  %s1223_s1 = inlined_call_operand.vmem [shape: bf16[32,36], index: 1, kind: input, shape index: {}]   ;;  %s1224_s2 = inlined_call_operand.vmem [shape: f32[32,1], index: 2, kind: input, shape index: {}]   ;;  %s1225_s3 = inlined_call_operand.vmem [shape: bf16[32,32], index: 3, kind: input, shape index: {}]   ;;  %s1226_s4 = inlined_call_operand.vmem [shape: f32[32,1], index: 4, kind: input, shape index: {}]   ;;  %s1227_s5 = inlined_call_operand.vmem [shape: bf16[32,32], index: 5, kind: input, shape index: {}]   ;;  %s1228_s6 = inlined_call_operand.vmem [shape: f32[32,1], index: 6, kind: input, shape index: {}]   ;;  %s1229_s7 = inlined_call_operand.hbm [shape: bf16[2,32,256], index: 7, kind: output, shape index: {}]  }
   0x1   :  { %14 = vsyncpa [#allocation3 + $0x1], 0  ;;  %s1037_s24 = smov 0   ;;  %s1039_s25 = smov 0  }
   0x2   :  { %s1041_s26 = smov 0   ;;  %s1043_s27 = smov 0  }
   0x3   :  { %s1045_s28 = smov 0   ;;  %s1047_s29 = smov 0  }
   0x4 LB: > { %s794_s30 = sadd.s32 4294967295, %s991_s29   ;;  %s795_s8 = sadd.s32 4294967294, %s991_s29   ;;  %s991_s29 = sphi %s1047_s29, %s20_s29   ;;  %s987_s28 = sphi %s1045_s28, %s1236_s28   ;;  %s983_s27 = sphi %s1043_s27, %s1235_s27   ;;  %s979_s26 = sphi %s1041_s26, %s1234_s26   ;;  %s975_s25 = sphi %s1039_s25, %s1233_s25   ;;  %s971_s24 = sphi %s1037_s24, %s1232_s24  }
   0x5   : > { %s32_s9 = sadd.s32 1, %s987_s28  ;;  %s195_s10 = sadd.s32 1, %s979_s26 }
   0x6   : > { %p34_p0 = scmp.ge.s32.totalorder %s32_s9, 2  ;;  %p205_p1 = scmp.ne.s32.totalorder %s979_s26, %s975_s25 }
   0x7   : > { %p206_p2 = scmp.eq.s32.totalorder %s794_s30, 1  ;;  %p211_p3 = scmp.ne.s32.totalorder %s975_s25, %s971_s24 }
   0x8   : > { %s1238_s9 = smov (%p34_p0, %s32_s9), 0  ;;  %p212_p5 = scmp.eq.s32.totalorder %s795_s8, 1 }
   0x9   : > { %p1077_p4 = por %p206_p2, %p205_p1  ;;  %s190_s12 = ssub.s32 %s987_s28, %s1238_s9 }
   0xa   : > { %p798_p6 = scmp.ge.s32.totalorder %s991_s29, 1  ;;  %p193_p7 = scmp.eq.s32.totalorder %s190_s12, 0 }
   0xb   : > { %p1084_p8 = por %p212_p5, %p211_p3  ;;  %p261_p9 = scmp.lt.s32.totalorder %s991_s29, 3 }
   0xc   : > { %s1090_s14 = scalar_select %p193_p7, %s979_s26, %s195_s10  }
   0xd   : > { %p262_p10 = pnand %p798_p6, %p261_p9 }
   0xe   : > { %p298_p11 = scmp.lt.s32.totalorder (!%p262_p10), %s983_s27, 1  ;;  %v993_v0 = vmov (!%p262_p10), 0   ;;  %v318_v1 = vld [vmem:[%s1224_s2] sm:$0xff] (!%p262_p10)  ;;  %v320_v2 = vld [vmem:[%s1224_s2 + $0x10] sm:$0xff] (!%p262_p10)  ;;  %v319_v3 = vld [vmem:[%s1224_s2 + $0x8] sm:$0xff] (!%p262_p10)  ;;  %vm384_vm0 = vcmask (!%p262_p10), 1041408  }
   0xf   : > { %265 = sbr.rel (%p262_p10) target bundleno = 746 (0x2ea), region = 48  ;;  %423 = vmatprep.mubr.bf16.mxu0 (!%p262_p10), %v993_v0  ;;  %897 = vset.pattern.permute.xlu0 (!%p262_p10), %v993_v0  ;;  %v321_v4 = vld [vmem:[%s1224_s2 + $0x18] sm:$0xff] (!%p262_p10)  ;;  %v460_v5 = vld [vmem:[%s1226_s4] sm:$0xff] (!%p262_p10)  ;;  %v461_v7 = vld [vmem:[%s1226_s4 + $0x8] sm:$0xff] (!%p262_p10)  ;;  %vm377_vm1 = vcmask (!%p262_p10), 293888   ;;  %vm494_vm2 = vcmask (!%p262_p10), 261120  }
  0x10   : > { %898 = vset.pattern.permute.xlu1 (!%p262_p10), %v993_v0  ;;  %543 = vmatprep.mubr.bf16.mxu1 (!%p262_p10), %v993_v0  ;;  %v462_v14 = vld [vmem:[%s1226_s4 + $0x10] sm:$0xff] (!%p262_p10)  ;;  %v463_v15 = vld [vmem:[%s1226_s4 + $0x18] sm:$0xff] (!%p262_p10)  ;;  %v570_v17 = vld [vmem:[%s1228_s6] sm:$0xff] (!%p262_p10)  ;;  %s833_s21 = sshll.u32 (!%p262_p10), %s983_s27, 9  ;;  %s994_s10 = smov (!%p262_p10), [#allocation2]  }
  0x11   : > { %324 = vperm.xlu0 (!%p262_p10), %897, %v318_v1   ;;  %334 = vperm.xlu1 (!%p262_p10), %898, %v320_v2   ;;  %v907_v18 = vld [vmem:[%s1223_s1] sm:$0xff] (!%p262_p10)   ;;  %v571_v19 = vld [vmem:[%s1228_s6 + $0x8] sm:$0xff] (!%p262_p10)  ;;  %v572_v20 = vld [vmem:[%s1228_s6 + $0x10] sm:$0xff] (!%p262_p10)  ;;  %s1172_s30 = scalar_lea.hbm (!%p262_p10), %s1229_s7, %s833_s21 }
  0x12   : > { %v573_v21 = vld [vmem:[%s1228_s6 + $0x18] sm:$0xff] (!%p262_p10)  ;;  %v908_v22 = vld [vmem:[%s1223_s1 + $0x8] sm:$0xff] (!%p262_p10)   ;;  %v909_v55 = vld [vmem:[%s1225_s3] sm:$0xff] (!%p262_p10)  }
  0x13   : > { %v910_v56 = vld [vmem:[%s1225_s3 + $0x8] sm:$0xff] (!%p262_p10)  }
  0x15   : > { %329 = vperm.xlu0 (!%p262_p10), %897, %v319_v3   ;;  %339 = vperm.xlu1 (!%p262_p10), %898, %v321_v4  }
  0x16   : > { %s299_s15 = scalar_select %p298_p11, %s983_s27, 1 }
  0x18   : > { %s838_s20 = smul.u32 40, %s299_s15  ;;  %s294_s15 = sand.u32 1, %s975_s25  }
  0x19   : > { %466 = vperm.xlu0 %897, %v460_v5   ;;  %471 = vperm.xlu1 %898, %v461_v7   ;;  %s799_s18 = sshll.u32 %s294_s15, 5  ;;  %s1176_s8 = scalar_lea.sflag [#allocation3], %s294_s15 }
  0x1a   : > { %s305_s12 = scalar_lea.vmem %s1222_s0, %s838_s20  ;;  %s296_s19 = scalar_lea.vmem [#allocation2], %s799_s18 }
  0x1b   : > { %v899_v6 = vld [vmem:[%s305_s12 + $0x4] ss:$8 sps:$4 sm:$0xff]   ;;  %v901_v8 = vld [vmem:[%s305_s12] ss:$8 sps:$4 sm:$0xff]   ;;  %v902_v9 = vld [vmem:[%s305_s12 + $0x14] ss:$8 sps:$4 sm:$0xff]  }
  0x1c   : > { %391 = vmatprep.subr.bf16.mxu0 %v899_v6  ;;  %v904_v10 = vld [vmem:[%s305_s12 + $0x10] ss:$8 sps:$4 sm:$0xff]   ;;  %v313_v11 = vld [vmem:[%s305_s12 + $0x20] sm:$0x33]  ;;  %s715_s20 = sshll.u32 %s296_s19, 4  ;;  %s917_s12 = sshll.u32 %s994_s10, 4  ;;  %s1167_s20 = int_to_ptr.vmem [resolvable:$true] %s715_s20  ;;  %s918_s12 = int_to_ptr.vmem [resolvable:$false] %s917_s12 }
  0x1d   : > { %392 = vmatpush1.bf16.msra.mxu0 %v901_v8  ;;  %v808_v12 = vcombine.high %v313_v11, %v313_v11  ;;  %v807_v13 = vcombine.low %v313_v11, %v313_v11  ;;  %476 = vperm.xlu0 %897, %v462_v14   ;;  %s913_s27 = scalar_lea.vmem %s1167_s20, 512  ;;  %s919_s16 = scalar_lea.vmem %s918_s12, 1024 }
  0x1e   : > { %393 = vmatprep.subr.bf16.mxu0 %v902_v9  ;;  %481 = vperm.xlu1 %898, %v463_v15   ;;  %p914_p12 = scmp.ne.s32.totalorder %s1167_s20, %s913_s27  ;;  %p920_p1 = scmp.lt.s32.totalorder %s1167_s20, %s918_s12 }
  0x1f   : > { %v386_v16 = vsel %vm384_vm0, %v807_v13, 0  ;;  %p921_p2 = scmp.lt.s32.totalorder %s919_s16, %s913_s27 }
  0x20   : > { %p915_p13 = pnand %p914_p12, %p1077_p4 }
  0x21   : > { %394 = vmatpush1.bf16.msra.mxu0 %v904_v10  ;;  %576 = vperm.xlu0 %897, %v570_v17   ;;  %p922_p3 = por %p921_p2, %p920_p1 }
  0x22   : > { %809 = vmatprep.subr.msk.bf16.mxu0 %vm384_vm0, %v808_v12  ;;  %581 = vperm.xlu1 %898, %v571_v19   ;;  %p916_p0 = pneg %p915_p13 }
  0x24   : > { %p923_p5 = pnand %p922_p3, %p916_p0 }
  0x25   : > { %396 = vmatpush1.bf16.msra.mxu0 %v386_v16  ;;  %586 = vperm.xlu0 %897, %v572_v20  }
  0x26   : > { %591 = vperm.xlu1 %898, %v573_v21  }
  0x28   : > { %810 = vmatmul.mubr.msk.bf16.vlgmr.msra.gmra.mrb[0].mxu0 %vm377_vm1, %v907_v18 }
  0x29   : > { %433 = vmatprep.mubr.bf16.mxu0 %v993_v0 }
  0x30   : > { %811 = vmatmul.mubr.msk.bf16.gmra.mrb[4].mxu0 %vm377_vm1, %v908_v22 }
  0x31   : > { %533 = vmatprep.mubr.bf16.mxu0 %v993_v0 }
  0x90   : > { %v325_v23 = vpop.permute.xlu0 %324  ;;  %v335_v32 = vpop.permute.xlu1 %334 }
  0x94   : > { %v330_v27 = vpop.permute.xlu0 %329  ;;  %v340_v43 = vpop.permute.xlu1 %339 }
  0x98   : > { %v467_v57 = vpop.permute.xlu0 %466  ;;  %v472_v58 = vpop.permute.xlu1 %471 }
  0x9c   : > { %v477_v59 = vpop.permute.xlu0 %476 }
  0x9d   : > { %v482_v60 = vpop.permute.xlu1 %481 }
  0xfb   : > { %v425_v24 = vpop.f32.mrb[0].mxu0 }
  0xfc   : > { %v426_v25 = vadd.f32 %v425_v24, %v325_v23  ;;  %v427_v26 = vpop.f32.mrb[1].mxu0 }
  0xfd   : > { %v428_v28 = vadd.f32 %v427_v26, %v325_v23  ;;  %v429_v29 = vpop.f32.mrb[2].mxu0  ;;  %v911_v26 = vld [vmem:[%s1227_s5] sm:$0xff]  }
  0xfe   : > { %v430_v30 = vadd.f32 %v429_v29, %v330_v27  ;;  %v431_v31 = vpop.f32.mrb[3].mxu0  ;;  %v444_v34 = vmax.f32 %v426_v25, 0.0 }
  0xff   : > { %v432_v33 = vadd.f32 %v431_v31, %v330_v27  ;;  %v445_v36 = vmax.f32 %v428_v28, 0.0  ;;  %v912_v27 = vld [vmem:[%s1227_s5 + $0x8] sm:$0xff]   ;;  %v577_v28 = vpop.permute.xlu0 %576 }
 0x100   : > { %v446_v35 = vmax.f32 %v430_v30, 0.0 }
 0x101   : > { %v447_v37 = vmax.f32 %v432_v33, 0.0 }
 0x102   : > { %v456_v38 = vpack.c.bf16 %v446_v35, %v444_v34 }
 0x103   : > { %v457_v39 = vpack.c.bf16 %v447_v37, %v445_v36  ;;  %v435_v40 = vpop.f32.mrb[4].mxu0 }
 0x104   : > { %v436_v41 = vadd.f32 %v435_v40, %v335_v32  ;;  %v437_v42 = vpop.f32.mrb[5].mxu0 }
 0x105   : > { %v438_v44 = vadd.f32 %v437_v42, %v335_v32  ;;  %v439_v45 = vpop.f32.mrb[6].mxu0  ;;  %501 = vmatprep.subr.bf16.mxu0 %v457_v39  ;;  %834 = vmatprep.subr.bf16.mxu1 %v457_v39  ;;  %v582_v32 = vpop.permute.xlu1 %581 }
 0x106   : > { %v440_v46 = vadd.f32 %v439_v45, %v340_v43  ;;  %v441_v47 = vpop.f32.mrb[7].mxu0  ;;  %502 = vmatpush1.bf16.msra.mxu0 %v456_v38  ;;  %836 = vmatpush1.bf16.msra.mxu1 %v456_v38  ;;  %v448_v49 = vmax.f32 %v436_v41, 0.0  ;;  %v587_v42 = vpop.permute.xlu0 %586 }
 0x107   : > { %v442_v48 = vadd.f32 %v441_v47, %v340_v43  ;;  %v449_v51 = vmax.f32 %v438_v44, 0.0 }
 0x108   : > { %v450_v50 = vmax.f32 %v440_v46, 0.0 }
 0x109   : > { %v451_v52 = vmax.f32 %v442_v48, 0.0  ;;  %v592_v47 = vpop.permute.xlu1 %591 }
 0x10a   : > { %v458_v53 = vpack.c.bf16 %v450_v50, %v448_v49 }
 0x10b   : > { %v459_v54 = vpack.c.bf16 %v451_v52, %v449_v51 }
 0x10d   : > { %503 = vmatprep.subr.bf16.mxu0 %v459_v54  ;;  %835 = vmatprep.subr.bf16.mxu1 %v459_v54 }
 0x10e   : > { %504 = vmatpush1.bf16.msra.mxu0 %v458_v53  ;;  %837 = vmatpush1.bf16.msra.mxu1 %v458_v53 }
 0x111   : > { %814 = vmatmul.mubr.msk.bf16.vlgmr.msra.gmra.mrb[8].mxu0 %vm494_vm2, %v909_v55  ;;  %815 = vmatmul.mubr.msk.bf16.vlgmr.msra.gmra.mrb[0].mxu1 %vm494_vm2, %v910_v56 }
 0x112   : > { %642 = vmatprep.mubr.bf16.mxu1 %v993_v0 }
 0x1e4   : > { %v535_v61 = vpop.f32.mrb[8].mxu0  ;;  %v545_v62 = vpop.f32.mrb[0].mxu1 }
 0x1e5   : > { %v536_v63 = vadd.f32 %v535_v61, %v467_v57  ;;  %v546_v1 = vadd.f32 %v545_v62, %v477_v59  ;;  %v537_v2 = vpop.f32.mrb[9].mxu0  ;;  %v547_v3 = vpop.f32.mrb[1].mxu1 }
 0x1e6   : > { %v538_v4 = vadd.f32 %v537_v2, %v467_v57  ;;  %v548_v5 = vadd.f32 %v547_v3, %v477_v59  ;;  %v539_v6 = vpop.f32.mrb[10].mxu0  ;;  %v549_v7 = vpop.f32.mrb[2].mxu1 }
 0x1e7   : > { %v540_v8 = vadd.f32 %v539_v6, %v472_v58  ;;  %v550_v9 = vadd.f32 %v549_v7, %v482_v60  ;;  %v541_v10 = vpop.f32.mrb[11].mxu0  ;;  %v551_v11 = vpop.f32.mrb[3].mxu1  ;;  %v554_v14 = vmax.f32 %v536_v63, 0.0  ;;  %v558_v15 = vmax.f32 %v546_v1, 0.0 }
 0x1e8   : > { %v542_v12 = vadd.f32 %v541_v10, %v472_v58  ;;  %v552_v13 = vadd.f32 %v551_v11, %v482_v60  ;;  %v555_v18 = vmax.f32 %v538_v4, 0.0  ;;  %v559_v19 = vmax.f32 %v548_v5, 0.0 }
 0x1e9   : > { %v556_v16 = vmax.f32 %v540_v8, 0.0  ;;  %v560_v17 = vmax.f32 %v550_v9, 0.0 }
 0x1ea   : > { %v557_v20 = vmax.f32 %v542_v12, 0.0  ;;  %v561_v21 = vmax.f32 %v552_v13, 0.0 }
 0x1eb   : > { %v566_v22 = vpack.c.bf16 %v556_v16, %v554_v14  ;;  %v568_v23 = vpack.c.bf16 %v560_v17, %v558_v15 }
 0x1ec   : > { %v567_v24 = vpack.c.bf16 %v557_v20, %v555_v18  ;;  %v569_v25 = vpack.c.bf16 %v561_v21, %v559_v19 }
 0x1ee   : > { %610 = vmatprep.subr.bf16.mxu1 %v567_v24 }
 0x1ef   : > { %611 = vmatpush1.bf16.msra.mxu1 %v566_v22 }
 0x1f0   : > { %612 = vmatprep.subr.bf16.mxu1 %v569_v25 }
 0x1f3   : > { %613 = vmatpush1.bf16.msra.mxu1 %v568_v23 }
 0x1f6   : > { %818 = vmatmul.mubr.msk.bf16.vlgmr.msra.gmra.mrb[4].mxu1 %vm494_vm2, %v911_v26 }
 0x1f7   : > { %652 = vmatprep.mubr.bf16.mxu1 %v993_v0 }
 0x1fe   : > { %819 = vmatmul.mubr.msk.bf16.gmra.mrb[8].mxu1 %vm494_vm2, %v912_v27 }
 0x2c9   : > { %v644_v29 = vpop.f32.mrb[4].mxu1 }
 0x2ca   : > { %v645_v30 = vadd.f32 %v644_v29, %v577_v28  ;;  %v646_v31 = vpop.f32.mrb[5].mxu1 }
 0x2cb   : > { %v647_v33 = vadd.f32 %v646_v31, %v577_v28  ;;  %v648_v34 = vpop.f32.mrb[6].mxu1 }
 0x2cc   : > { %v663_v35 = vmax.f32 %v645_v30, 0.0  ;;  %v649_v36 = vadd.f32 %v648_v34, %v582_v32  ;;  %v650_v37 = vpop.f32.mrb[7].mxu1 }
 0x2cd   : > { %v664_v0 = vmax.f32 %v647_v33, 0.0  ;;  %v651_v38 = vadd.f32 %v650_v37, %v582_v32 }
 0x2ce   : > { %v665_v39 = vmax.f32 %v649_v36, 0.0 }
 0x2cf   : > { %v829_v40 = vpack.c.bf16 %v664_v0, %v663_v35  ;;  %v666_v41 = vmax.f32 %v651_v38, 0.0 }
 0x2d1   : > { %695 = vst [vmem:[%s296_s19] sm:$0xff] %v829_v40  ;;  %v830_v43 = vpack.c.bf16 %v666_v41, %v665_v39  ;;  %v654_v44 = vpop.f32.mrb[8].mxu1 }
 0x2d2   : > { %v655_v45 = vadd.f32 %v654_v44, %v587_v42  ;;  %v656_v46 = vpop.f32.mrb[9].mxu1 }
 0x2d3   : > { %696 = vst [vmem:[%s296_s19 + $0x8] sm:$0xff] %v830_v43  ;;  %v657_v48 = vadd.f32 %v656_v46, %v587_v42  ;;  %v658_v49 = vpop.f32.mrb[10].mxu1 }
 0x2d4   : > { %v667_v50 = vmax.f32 %v655_v45, 0.0  ;;  %v659_v51 = vadd.f32 %v658_v49, %v592_v47  ;;  %v660_v52 = vpop.f32.mrb[11].mxu1 }
 0x2d5   : > { %v668_v53 = vmax.f32 %v657_v48, 0.0  ;;  %v661_v54 = vadd.f32 %v660_v52, %v592_v47 }
 0x2d6   : > { %v669_v55 = vmax.f32 %v659_v51, 0.0 }
 0x2d7   : > { %v831_v56 = vpack.c.bf16 %v668_v53, %v667_v50  ;;  %v670_v57 = vmax.f32 %v661_v54, 0.0 }
 0x2d9   : > { %697 = vst [vmem:[%s296_s19 + $0x10] sm:$0xff] %v831_v56  ;;  %v832_v58 = vpack.c.bf16 %v670_v57, %v669_v55 }
 0x2db   : > { %698 = vst [vmem:[%s296_s19 + $0x18] sm:$0xff] %v832_v58 }
 0x2dc   : > { %926 = shalt.err (!%p923_p5)
}
 0x2dd   : > { %s927_s17 = scalar_lea.hbm %s1172_s30, 512  ;;  %s931_s19 = scalar_lea.hbm %s1229_s7, 1024 }
 0x2de   : > { %p928_p6 = scmp.ne.s32.totalorder %s1172_s30, %s927_s17  ;;  %p932_p10 = scmp.lt.u32.totalorder %s1172_s30, %s1229_s7 }
 0x2df   : > { %p933_p11 = scmp.lt.u32.totalorder %s931_s19, %s927_s17  ;;  %p935_p13 = scmp.lt.u32.totalorder %s927_s17, %s1172_s30 }
 0x2e0   : > { %p929_p7 = pnand %p928_p6, %p1077_p4 }
 0x2e1   : > { %p934_p12 = por %p933_p11, %p932_p10 }
 0x2e2   : > { %p930_p9 = pneg %p929_p7 }
 0x2e3   : > { %p936_p0 = por %p935_p13, %p934_p12 }
 0x2e5   : > { %p937_p1 = pnand %p936_p0, %p930_p9 }
 0x2e7   : > { %940 = shalt.err (!%p937_p1)
}
 0x2e8   : > { %s995_s23 = smov 128   ;;  %s996_s27 = smov 8  }
 0x2e9   : > { %839 = dma.vmem_to_hbm [thread:$0]  (%p1077_p4), %s1167_s20, 512, %s1172_s30, %s1176_s8, %s995_s23, %s995_s23, %s996_s27  }
 0x2ea PF: > { %p845_p2 = scmp.ge.s32.totalorder %s991_s29, 2  ;;  %s730_s10 = sand.u32 1, %s971_s24  }
 0x2eb   : > { %s731_s12 = scalar_lea.sflag [#allocation3], %s730_s10 }
 0x2ec   : > { %p842_p3 = pnand %p845_p2, %p1084_p8 }
 0x2ee   : > { %966 = dma.done.wait (!%p842_p3), %s731_s12, 512  }
 0x2ef   : > { %968 = vsyncadd (!%p842_p3), %s731_s12, 4294966784  ;;  %s20_s29 = sadd.s32 1, %s991_s29   ;;  %s1232_s24 = smov %s975_s25 }
 0x2f0   : > { %p17_p5 = scmp.ge.s32.totalorder %s20_s29, 4   ;;  %s1233_s25 = smov %s979_s26 }
 0x2f1   : > { %s1234_s26 = smov %s1090_s14  ;;  %s1235_s27 = smov %s987_s28 }
 0x2f2   : > { %s1236_s28 = smov %s1238_s9  ;;  %19 = sbr.rel (!%p17_p5) target bundleno = 4 (0x4), region = 83 }
 0x2f9   :  { %736 = vsyncpa [#allocation3], 1 }
 0x2fa   :  { %738 = vsyncpa [#allocation3 + $0x1], 1 }

</bundles_post_ra>
